<compile_context>
chip_gen: v7x
topology: tpu7x:2x2x1
jax: 0.10.0
libtpu: 0.0.40
codegen_flags: <defaults>
</compile_context>

<pallas_src>
import functools

import jax
import jax.numpy as jnp
from jax.experimental import pallas as pl
from jax.experimental.pallas import tpu as pltpu

FC1_OUT = 256
FC2_OUT = 128
VALUE_OUT = 1
LANES = 128

_VMEM_BUDGET = 48 * 1024 * 1024  # leaves headroom under v7x's 64 MiB/TC


def _round_up(n, m):
    return ((n + m - 1) // m) * m


# ----------------------------------------------------------------------------
# Kernel
# ----------------------------------------------------------------------------
def critic_kernel(x_ref, w1_ref, b1_ref, w2_ref, b2_ref, w3t_ref, b3_ref,
                  o_ref):
    # fc1 + ReLU. x is read in its HBM dtype and cast at the dot; bf16 MXU
    # inputs, f32 accumulate, f32 bias/ReLU epilogue (v5e has no bf16 VPU).
    # Dropout = identity (eval mode).
    x = x_ref[...].astype(jnp.bfloat16)
    h = jnp.dot(x, w1_ref[...], preferred_element_type=jnp.float32)
    h = jnp.maximum(h + b1_ref[...], 0.0)
    # fc2 + ReLU
    h = jnp.dot(h.astype(jnp.bfloat16), w2_ref[...],
                preferred_element_type=jnp.float32)
    h = jnp.maximum(h + b2_ref[...], 0.0)
    # Value head, packed lane-dense: (8, h2) x (tm, h2)^T -> (8, tm); row 0 is
    # the value for each batch row (rows 1..7 of w3t are zero). The store is a
    # full-lane (1, tm) row -- batch lives on the lane axis of the output.
    v = jax.lax.dot_general(
        w3t_ref[...], h.astype(jnp.bfloat16),
        dimension_numbers=(((1,), (1,)), ((), ())),
        preferred_element_type=jnp.float32)
    o_ref[...] = v[0:1, :] + b3_ref[0, 0]


# ----------------------------------------------------------------------------
# Parameter init / prep
# ----------------------------------------------------------------------------
def init_linear(key, fan_in, fan_out):
    """PyTorch nn.Linear default init: U(-1/sqrt(fan_in), 1/sqrt(fan_in)).
    Stored as (in, out); PyTorch stores (out, in) and computes x @ W.T."""
    kw, kb = jax.random.split(key)
    bound = 1.0 / jnp.sqrt(jnp.float32(fan_in))
    w = jax.random.uniform(kw, (fan_in, fan_out), jnp.float32, -bound, bound)
    b = jax.random.uniform(kb, (fan_out,), jnp.float32, -bound, bound)
    return w, b


def prepare_params(params):
    """One-time prep:
      - fc1/fc2 weights -> bf16, out dims zero-padded to multiples of 128
        (the fc1 INPUT dim is left as-is: the kernel reads x unpadded);
      - biases -> (1, out_p) f32;
      - value head -> transposed bf16 (8, h2_p) block (row 0 = weights) for
        the packed trans-B matmul; its bias -> (1, 1) f32 scalar (SMEM)."""
    (w1, b1), (w2, b2), (w3, b3) = params
    d_in, h1 = w1.shape
    h2 = w2.shape[1]
    h1_p, h2_p = _round_up(h1, LANES), _round_up(h2, LANES)

    w1_p = jnp.zeros((d_in, h1_p), jnp.bfloat16)
    w1_p = w1_p.at[:, :h1].set(w1.astype(jnp.bfloat16))
    b1_p = jnp.zeros((1, h1_p), jnp.float32).at[0, :h1].set(b1)

    w2_p = jnp.zeros((h1_p, h2_p), jnp.bfloat16)
    w2_p = w2_p.at[:h1, :h2].set(w2.astype(jnp.bfloat16))
    b2_p = jnp.zeros((1, h2_p), jnp.float32).at[0, :h2].set(b2)

    w3t = jnp.zeros((8, h2_p), jnp.bfloat16)
    w3t = w3t.at[0, :h2].set(w3[:, 0].astype(jnp.bfloat16))
    b3_s = jnp.asarray(b3, jnp.float32).reshape(1, 1)

    return (w1_p, b1_p), (w2_p, b2_p), (w3t, b3_s)


# ----------------------------------------------------------------------------
# Tile / VMEM sizing
# ----------------------------------------------------------------------------
def _vmem_estimate(tm, d_in, h1_p, h2_p, x_itemsize):
    x_tile = tm * d_in * x_itemsize * 2              # double-buffered input tile
    o_tile = tm * 4 * 2                              # packed (1, tm) f32 output
    weights = (d_in * h1_p + h1_p * h2_p + 8 * h2_p) * 2 * 2  # bf16, 2 bufs
    biases = (h1_p + h2_p) * 4 * 2
    temps = tm * (h1_p + h2_p + 8) * 4               # f32 activations in-kernel
    return x_tile + o_tile + weights + biases + temps


def _pick_batch_tile(tm, batch, d_in, h1_p, h2_p, x_itemsize):
    tm = max(1, min(tm, batch))
    while True:
        if tm < batch:
            # Multi-step grid: keep tm a multiple of 128 so the packed (1, tm)
            # output stores stay lane-dense (block dims equal to the full
            # array dim are always legal, so the single-step case is exempt).
            tm = max(128, (tm // 128) * 128)
        if tm <= 128 or _vmem_estimate(tm, d_in, h1_p, h2_p,
                                       x_itemsize) <= _VMEM_BUDGET:
            return tm
        tm //= 2


# ----------------------------------------------------------------------------
# Forward
# ----------------------------------------------------------------------------
@functools.partial(jax.jit, static_argnames=("tm", "core_parallel"))
def critic_forward(x_flat, prepared_params, *, tm=512, core_parallel=False):
    """x_flat: (batch, fc1_input_size) flattened conv features (any float
    dtype; cast to bf16 inside the kernel). prepared_params: output of
    prepare_params. Returns (batch, 1) values.

    core_parallel=True switches the batch grid axis to pltpu.CORE_PARALLEL so
    multi-step grids split across v7x's two TensorCores (leave False on
    v5e/v6e)."""
    (w1, b1), (w2, b2), (w3t, b3) = prepared_params
    batch, d_in = x_flat.shape
    assert w1.shape[0] == d_in, "fc1_input_size mismatch"
    h1_p, h2_p = w1.shape[1], w2.shape[1]

    itemsize = x_flat.dtype.itemsize
    tm = _pick_batch_tile(tm, batch, d_in, h1_p, h2_p, itemsize)
    grid = (pl.cdiv(batch, tm),)

    est = _vmem_estimate(tm, d_in, h1_p, h2_p, itemsize)
    vmem_limit = int(min(max(est + (2 << 20), 16 << 20), 56 << 20))

    flops = 2 * batch * (d_in * h1_p + h1_p * h2_p + h2_p * 8)
    bytes_accessed = (batch * d_in * itemsize
                      + (w1.size + w2.size + w3t.size) * 2
                      + (b1.size + b2.size + b3.size) * 4
                      + batch * 4)

    dim_sem = (pltpu.CORE_PARALLEL,) if core_parallel else ("parallel",)

    out_packed = pl.pallas_call(
        critic_kernel,
        out_shape=jax.ShapeDtypeStruct((1, batch), jnp.float32),
        grid_spec=pltpu.PrefetchScalarGridSpec(
            num_scalar_prefetch=0,
            grid=grid,
            in_specs=[
                pl.BlockSpec((tm, d_in), lambda i: (i, 0)),      # x tile (unpadded)
                pl.BlockSpec((d_in, h1_p), lambda i: (0, 0)),    # fc1 W (resident)
                pl.BlockSpec((1, h1_p), lambda i: (0, 0)),       # fc1 b
                pl.BlockSpec((h1_p, h2_p), lambda i: (0, 0)),    # fc2 W
                pl.BlockSpec((1, h2_p), lambda i: (0, 0)),       # fc2 b
                pl.BlockSpec((8, h2_p), lambda i: (0, 0)),       # value W^T
                pl.BlockSpec(memory_space=pltpu.MemorySpace.SMEM),  # value b
            ],
            out_specs=pl.BlockSpec((1, tm), lambda i: (0, i)),   # packed values
        ),
        compiler_params=pltpu.CompilerParams(
            dimension_semantics=dim_sem,
            vmem_limit_bytes=vmem_limit,
        ),
        cost_estimate=pl.CostEstimate(
            flops=flops, transcendentals=0, bytes_accessed=bytes_accessed),
    )(x_flat, w1, b1, w2, b2, w3t, b3)

    return out_packed.reshape(batch, 1)


def critic_forward_reference(x_flat, params):
    """Plain-jnp reference with the same math path (bf16 matmul inputs, f32
    accumulate, f32 bias/ReLU, eval-mode dropout). Also the recommended path
    for tiny batches where the Pallas call is launch-overhead bound."""
    h = x_flat
    for (w, b) in params[:-1]:
        h = jnp.dot(h.astype(jnp.bfloat16), w.astype(jnp.bfloat16),
                    preferred_element_type=jnp.float32) + b[None, :]
        h = jnp.maximum(h, 0.0)
    w3, b3 = params[-1]
    return jnp.dot(h.astype(jnp.bfloat16), w3.astype(jnp.bfloat16),
                   preferred_element_type=jnp.float32) + b3[None, :]


if __name__ == "__main__":
    # Small, module-consistent shapes: conv features (batch=2, C=4, H=8, W=8)
    # -> fc1_input_size = 256; fc1(256->256), fc2(256->128), value_head(128->1).
    batch, C, H, W = 2, 4, 8, 8
    fc1_input_size = C * H * W

    key = jax.random.PRNGKey(0)
    kx, k1, k2, k3, kx2 = jax.random.split(key, 5)

    # conv_net output stand-in (the injected conv module itself is not spec'd).
    x = jax.random.normal(kx, (batch, C, H, W), jnp.float32)
    x_flat = x.reshape(-1, fc1_input_size)          # == x.view(-1, fc1_input_size)

    params = [
        init_linear(k1, fc1_input_size, FC1_OUT),
        init_linear(k2, FC1_OUT, FC2_OUT),
        init_linear(k3, FC2_OUT, VALUE_OUT),
    ]
    prepared = prepare_params(params)

    # 1) Nominal module batch (single-block path).
    value = jax.block_until_ready(critic_forward(x_flat, prepared))
    ref = critic_forward_reference(x_flat, params)
    assert value.shape == (batch, VALUE_OUT)
    assert jnp.allclose(value, ref, atol=2e-3, rtol=2e-3)

    # 2) Multi-step grid with a ragged tail block (batch not a multiple of the
    #    tile): exercises the no-batch-padding path and the packed output.
    big_batch = 200
    xb = jax.random.normal(kx2, (big_batch, fc1_input_size), jnp.float32)
    vb = jax.block_until_ready(critic_forward(xb, prepared, tm=128))
    refb = critic_forward_reference(xb, params)
    assert vb.shape == (big_batch, VALUE_OUT)
    assert jnp.allclose(vb, refb, atol=2e-3, rtol=2e-3)

    print("KERNEL_OK")
</pallas_src>

<mosaic_0001>
module attributes {stable_mosaic.version = 11 : i64} {
  func.func @critic_kernel(%arg0: i32, %arg1: memref<2x256xf32, #tpu.memory_space<vmem>>, %arg2: memref<256x256xbf16, #tpu.memory_space<vmem>>, %arg3: memref<1x256xf32, #tpu.memory_space<vmem>>, %arg4: memref<256x128xbf16, #tpu.memory_space<vmem>>, %arg5: memref<1x128xf32, #tpu.memory_space<vmem>>, %arg6: memref<8x128xbf16, #tpu.memory_space<vmem>>, %arg7: memref<1x1xf32, #tpu.memory_space<smem>>, %arg8: memref<1x2xf32, #tpu.memory_space<vmem>>) attributes {dimension_semantics = [#tpu.dimension_semantics<parallel>], iteration_bounds = array<i64: 1>, scalar_prefetch = 0 : i64, scratch_operands = 0 : i64, tpu.core_type = #tpu.core_type<tc>, window_params = [{transform_indices = @transform_0, window_bounds = array<i64: 2, 256>}, {pipeline_mode = #tpu.pipeline_mode<synchronous>, transform_indices = @transform_1, window_bounds = array<i64: 256, 256>}, {pipeline_mode = #tpu.pipeline_mode<synchronous>, transform_indices = @transform_2, window_bounds = array<i64: 1, 256>}, {pipeline_mode = #tpu.pipeline_mode<synchronous>, transform_indices = @transform_3, window_bounds = array<i64: 256, 128>}, {pipeline_mode = #tpu.pipeline_mode<synchronous>, transform_indices = @transform_4, window_bounds = array<i64: 1, 128>}, {pipeline_mode = #tpu.pipeline_mode<synchronous>, transform_indices = @transform_5, window_bounds = array<i64: 8, 128>}, {transform_indices = @transform_6, window_bounds = array<i64: 1, 1>}, {transform_indices = @transform_7, window_bounds = array<i64: 1, 2>}]} {
    %c0 = arith.constant 0 : index
    %c0_0 = arith.constant 0 : index
    %0 = vector.load %arg1[%c0, %c0_0] : memref<2x256xf32, #tpu.memory_space<vmem>>, vector<2x256xf32>
    %1 = arith.truncf %0 : vector<2x256xf32> to vector<2x256xbf16>
    %c0_1 = arith.constant 0 : index
    %c0_2 = arith.constant 0 : index
    %2 = vector.load %arg2[%c0_1, %c0_2] : memref<256x256xbf16, #tpu.memory_space<vmem>>, vector<256x256xbf16>
    %cst = arith.constant dense<0.000000e+00> : vector<2x256xf32>
    %3 = tpu.matmul %1, %2, %cst {dimension_numbers = #tpu.dot_dimension_numbers<[1], [0], [0], [1], [0, 0, 1, 1], [], []>} : vector<2x256xbf16>, vector<256x256xbf16>, vector<2x256xf32> -> vector<2x256xf32>
    %c0_3 = arith.constant 0 : index
    %c0_4 = arith.constant 0 : index
    %4 = vector.load %arg3[%c0_3, %c0_4] : memref<1x256xf32, #tpu.memory_space<vmem>>, vector<1x256xf32>
    %5 = vector.broadcast %4 : vector<1x256xf32> to vector<2x256xf32>
    %6 = arith.addf %3, %5 : vector<2x256xf32>
    %cst_5 = arith.constant 0.000000e+00 : f32
    %7 = vector.broadcast %cst_5 : f32 to vector<2x256xf32>
    %8 = arith.maximumf %6, %7 : vector<2x256xf32>
    %9 = arith.truncf %8 : vector<2x256xf32> to vector<2x256xbf16>
    %c0_6 = arith.constant 0 : index
    %c0_7 = arith.constant 0 : index
    %10 = vector.load %arg4[%c0_6, %c0_7] : memref<256x128xbf16, #tpu.memory_space<vmem>>, vector<256x128xbf16>
    %cst_8 = arith.constant dense<0.000000e+00> : vector<2x128xf32>
    %11 = tpu.matmul %9, %10, %cst_8 {dimension_numbers = #tpu.dot_dimension_numbers<[1], [0], [0], [1], [0, 0, 1, 1], [], []>} : vector<2x256xbf16>, vector<256x128xbf16>, vector<2x128xf32> -> vector<2x128xf32>
    %c0_9 = arith.constant 0 : index
    %c0_10 = arith.constant 0 : index
    %12 = vector.load %arg5[%c0_9, %c0_10] : memref<1x128xf32, #tpu.memory_space<vmem>>, vector<1x128xf32>
    %13 = vector.broadcast %12 : vector<1x128xf32> to vector<2x128xf32>
    %14 = arith.addf %11, %13 : vector<2x128xf32>
    %cst_11 = arith.constant 0.000000e+00 : f32
    %15 = vector.broadcast %cst_11 : f32 to vector<2x128xf32>
    %16 = arith.maximumf %14, %15 : vector<2x128xf32>
    %c0_12 = arith.constant 0 : index
    %c0_13 = arith.constant 0 : index
    %17 = vector.load %arg6[%c0_12, %c0_13] : memref<8x128xbf16, #tpu.memory_space<vmem>>, vector<8x128xbf16>
    %18 = arith.truncf %16 : vector<2x128xf32> to vector<2x128xbf16>
    %cst_14 = arith.constant dense<0.000000e+00> : vector<8x2xf32>
    %19 = tpu.matmul %17, %18, %cst_14 {dimension_numbers = #tpu.dot_dimension_numbers<[1], [1], [0], [0], [0, 0, 1, 0], [], []>} : vector<8x128xbf16>, vector<2x128xbf16>, vector<8x2xf32> -> vector<8x2xf32>
    %20 = vector.extract_strided_slice %19 {offsets = [0, 0], sizes = [1, 2], strides = [1, 1]} : vector<8x2xf32> to vector<1x2xf32>
    %c0_15 = arith.constant 0 : index
    %c0_16 = arith.constant 0 : index
    %21 = memref.load %arg7[%c0_15, %c0_16] : memref<1x1xf32, #tpu.memory_space<smem>>
    %22 = vector.broadcast %21 : f32 to vector<1x2xf32>
    %23 = arith.addf %20, %22 : vector<1x2xf32>
    %c0_17 = arith.constant 0 : index
    %c0_18 = arith.constant 0 : index
    %24 = vector.load %arg8[%c0_17, %c0_18] : memref<1x2xf32, #tpu.memory_space<vmem>>, vector<1x2xf32>
    tpu.vector_store %arg8[%c0_17, %c0_18], %23 {strides = array<i32>} : memref<1x2xf32, #tpu.memory_space<vmem>>, vector<1x2xf32>,
    return
  }
  func.func @transform_0(%arg0: i32) -> (i32, i32) {
    %c0_i32 = arith.constant 0 : i32
    %c0_i32_0 = arith.constant 0 : i32
    return %arg0, %c0_i32 : i32, i32
  }
  func.func @transform_1(%arg0: i32) -> (i32, i32) {
    %c0_i32 = arith.constant 0 : i32
    %c0_i32_0 = arith.constant 0 : i32
    %c0_i32_1 = arith.constant 0 : i32
    return %c0_i32, %c0_i32_0 : i32, i32
  }
  func.func @transform_2(%arg0: i32) -> (i32, i32) {
    %c0_i32 = arith.constant 0 : i32
    %c0_i32_0 = arith.constant 0 : i32
    %c0_i32_1 = arith.constant 0 : i32
    return %c0_i32, %c0_i32_0 : i32, i32
  }
  func.func @transform_3(%arg0: i32) -> (i32, i32) {
    %c0_i32 = arith.constant 0 : i32
    %c0_i32_0 = arith.constant 0 : i32
    %c0_i32_1 = arith.constant 0 : i32
    return %c0_i32, %c0_i32_0 : i32, i32
  }
  func.func @transform_4(%arg0: i32) -> (i32, i32) {
    %c0_i32 = arith.constant 0 : i32
    %c0_i32_0 = arith.constant 0 : i32
    %c0_i32_1 = arith.constant 0 : i32
    return %c0_i32, %c0_i32_0 : i32, i32
  }
  func.func @transform_5(%arg0: i32) -> (i32, i32) {
    %c0_i32 = arith.constant 0 : i32
    %c0_i32_0 = arith.constant 0 : i32
    %c0_i32_1 = arith.constant 0 : i32
    return %c0_i32, %c0_i32_0 : i32, i32
  }
  func.func @transform_6(%arg0: i32) -> (i32, i32) {
    %c0_i32 = arith.constant 0 : i32
    %c0_i32_0 = arith.constant 0 : i32
    %c0_i32_1 = arith.constant 0 : i32
    return %c0_i32, %c0_i32_0 : i32, i32
  }
  func.func @transform_7(%arg0: i32) -> (i32, i32) {
    %c0_i32 = arith.constant 0 : i32
    %c0_i32_0 = arith.constant 0 : i32
    return %c0_i32, %arg0 : i32, i32
  }
}

</mosaic_0001>

<bundles_post_ra>
// kernel: critic_forward.1
= control target key start
LH: loop header
LB: loop body
LE: loop exit
PB: predicated region body
PF: predicated region fallthrough
CT: control target
= control target key end

     0   :  { %13 = vsyncpa [#allocation4], 0  ;;  %s934_s0 = inlined_call_operand.hbm [shape: f32[2,256], index: 0, kind: input, shape index: {}]   ;;  %s935_s1 = inlined_call_operand.hbm [shape: bf16[256,256], index: 1, kind: input, shape index: {}]   ;;  %s936_s2 = inlined_call_operand.vmem [shape: f32[1,256], index: 2, kind: input, shape index: {}]   ;;  %s937_s3 = inlined_call_operand.hbm [shape: bf16[256,128], index: 3, kind: input, shape index: {}]   ;;  %s938_s4 = inlined_call_operand.vmem [shape: f32[1,128], index: 4, kind: input, shape index: {}]   ;;  %s939_s5 = inlined_call_operand.vmem [shape: bf16[8,128], index: 5, kind: input, shape index: {}]   ;;  %s940_s6 = inlined_call_operand.<no memory space> [shape: f32[1,1], index: 6, kind: input, shape index: {}]   ;;  %s941_s7 = inlined_call_operand.hbm [shape: f32[1,2], index: 7, kind: output, shape index: {}]  }
   0x1   :  { %14 = vsyncpa [#allocation7], 0 }
   0x2   :  { %15 = vsyncpa [#allocation5], 0  ;;  %s818_s24 = smov [#allocation6]   ;;  %s724_s28 = scalar_lea.hbm %s935_s1, 4096 }
   0x3   :  { %s31_s25 = sshll.u32 %s818_s24, 4  ;;  %p725_p0 = scmp.ne.s32.totalorder %s935_s1, %s724_s28  ;;  %s32_s25 = int_to_ptr.vmem [resolvable:$true] %s31_s25 }
   0x4   :  { %p728_p1 = scmp.lt.u32.totalorder %s724_s28, %s935_s1 }
   0x6   :  { %p730_p2 = pnand %p728_p1, %p725_p0 }
   0x8   :  { %733 = shalt.err (!%p730_p2)
}
   0x9   :  { %s734_s10 = scalar_lea.vmem %s32_s25, 4096  ;;  %p739_p4 = scmp.lt.s32.totalorder %s32_s25, %s32_s25 }
   0xa   :  { %p735_p3 = scmp.ne.s32.totalorder %s32_s25, %s734_s10  ;;  %p740_p5 = scmp.lt.s32.totalorder %s734_s10, %s734_s10 }
   0xc   :  { %p741_p6 = por %p740_p5, %p739_p4 }
   0xe   :  { %p742_p7 = pnand %p741_p6, %p735_p3 }
  0x10   :  { %745 = shalt.err (!%p742_p7)
}
  0x11   :  { %s819_s11 = smov 128   ;;  %s820_s12 = smov 8  }
  0x12   :  { %37 = dma.hbm_to_vmem [thread:$0]  %s935_s1, 4096, %s32_s25, [#allocation7], %s819_s11, %s819_s11, %s820_s12  }
  0x13   :  { %s821_s15 = smov [#allocation3]   ;;  %s822_s17 = smov [#allocation8]  }
  0x14   :  { %s22_s16 = sshll.u32 %s821_s15, 4  ;;  %s45_s18 = sshll.u32 %s822_s17, 4  ;;  %s23_s16 = int_to_ptr.vmem [resolvable:$true] %s22_s16  ;;  %s46_s18 = int_to_ptr.vmem [resolvable:$true] %s45_s18 }
  0x15   :  { %s746_s21 = scalar_lea.hbm %s934_s0, 64 }
  0x16   :  { %p747_p8 = scmp.ne.s32.totalorder %s934_s0, %s746_s21  ;;  %p750_p9 = scmp.lt.u32.totalorder %s746_s21, %s934_s0 }
  0x18   :  { %p752_p10 = pnand %p750_p9, %p747_p8 }
  0x1a   :  { %755 = shalt.err (!%p752_p10)
}
  0x1b   :  { %s756_s1 = scalar_lea.vmem %s23_s16, 64  ;;  %p761_p12 = scmp.lt.s32.totalorder %s23_s16, %s23_s16 }
  0x1c   :  { %p757_p11 = scmp.ne.s32.totalorder %s23_s16, %s756_s1  ;;  %p762_p13 = scmp.lt.s32.totalorder %s756_s1, %s756_s1 }
  0x1e   :  { %p763_p0 = por %p762_p13, %p761_p12 }
  0x20   :  { %p764_p1 = pnand %p763_p0, %p757_p11 }
  0x22   :  { %767 = shalt.err (!%p764_p1)
}
  0x23   :  { %25 = dma.hbm_to_vmem [thread:$0]  %s934_s0, 64, %s23_s16, [#allocation4]  }
  0x24   :  { %s768_s30 = scalar_lea.hbm %s937_s3, 2048 }
  0x25   :  { %p769_p2 = scmp.ne.s32.totalorder %s937_s3, %s768_s30  ;;  %p772_p3 = scmp.lt.u32.totalorder %s768_s30, %s937_s3 }
  0x27   :  { %p774_p4 = pnand %p772_p3, %p769_p2 }
  0x29   :  { %777 = shalt.err (!%p774_p4)
}
  0x2a   :  { %s778_s12 = scalar_lea.vmem %s46_s18, 2048  ;;  %p783_p6 = scmp.lt.s32.totalorder %s46_s18, %s46_s18 }
  0x2b   :  { %p779_p5 = scmp.ne.s32.totalorder %s46_s18, %s778_s12  ;;  %p784_p7 = scmp.lt.s32.totalorder %s778_s12, %s778_s12 }
  0x2d   :  { %p785_p8 = por %p784_p7, %p783_p6 }
  0x2f   :  { %p786_p9 = pnand %p785_p8, %p779_p5 }
  0x31   :  { %789 = shalt.err (!%p786_p9)
}
  0x32   :  { %s823_s0 = smov 64   ;;  %s824_s13 = smov 4  }
  0x33   :  { %51 = dma.hbm_to_vmem [thread:$0]  %s937_s3, 2048, %s46_s18, [#allocation7], %s823_s0, %s823_s0, %s824_s13  }
  0x34   :  { %812 = dma.done.wait [#allocation4], 64  }
  0x35   :  { %813 = vsyncadd [#allocation4], 4294967232 }
  0x36   :  { %814 = dma.done.wait [#allocation7], 6144  }
  0x37   :  { %815 = vsyncadd [#allocation7], 4294961152  ;;  %v660_v0 = vld [vmem:[#allocation6 + $0x4] ss:$8 sps:$4 sm:$0xff]   ;;  %v662_v1 = vld [vmem:[#allocation6] ss:$8 sps:$4 sm:$0xff]   ;;  %v116_v52 = vlaneseq }
  0x38   :  { %286 = vmatprep.subr.bf16.mxu0 %v660_v0  ;;  %v663_v2 = vld [vmem:[#allocation6 + $0x14] ss:$8 sps:$4 sm:$0xff]   ;;  %v665_v3 = vld [vmem:[#allocation6 + $0x10] ss:$8 sps:$4 sm:$0xff]   ;;  %v666_v4 = vld [vmem:[#allocation6 + $0x24] ss:$8 sps:$4 sm:$0xff]  }
  0x39   :  { %287 = vmatpush1.bf16.msra.mxu0 %v662_v1  ;;  %v668_v5 = vld [vmem:[#allocation6 + $0x20] ss:$8 sps:$4 sm:$0xff]   ;;  %v669_v6 = vld [vmem:[#allocation6 + $0x34] ss:$8 sps:$4 sm:$0xff]   ;;  %v671_v7 = vld [vmem:[#allocation6 + $0x30] ss:$8 sps:$4 sm:$0xff]  }
  0x3a   :  { %288 = vmatprep.subr.bf16.mxu0 %v663_v2  ;;  %v672_v8 = vld [vmem:[#allocation6 + $0x44] ss:$8 sps:$4 sm:$0xff]   ;;  %v674_v9 = vld [vmem:[#allocation6 + $0x40] ss:$8 sps:$4 sm:$0xff]   ;;  %v675_v10 = vld [vmem:[#allocation6 + $0x54] ss:$8 sps:$4 sm:$0xff]  }
  0x3b   :  { %v677_v11 = vld [vmem:[#allocation6 + $0x50] ss:$8 sps:$4 sm:$0xff]   ;;  %v678_v12 = vld [vmem:[#allocation6 + $0x64] ss:$8 sps:$4 sm:$0xff]   ;;  %v680_v13 = vld [vmem:[#allocation6 + $0x60] ss:$8 sps:$4 sm:$0xff]  }
  0x3c   :  { %v904_v14 = vld.sshfl [vmem:[#allocation3] sm:$0x33 pattern:$0x76325410]  ;;  %v708_v17 = vld [vmem:[#allocation8 + $0x40] sm:$0xff]   ;;  %v710_v20 = vld [vmem:[#allocation8 + $0x48] sm:$0xff]  }
  0x3d   :  { %289 = vmatpush1.bf16.msra.mxu0 %v665_v3  ;;  %v681_v15 = vld [vmem:[#allocation6 + $0x74] ss:$8 sps:$4 sm:$0xff]   ;;  %v77_v16 = vcombine.high %v904_v14, %v904_v14  ;;  %v709_v18 = vld [vmem:[#allocation8] sm:$0xff]   ;;  %620 = vmatprep.subr.bf16.mxu1 %v708_v17  ;;  %v711_v21 = vld [vmem:[#allocation8 + $0x8] sm:$0xff]   ;;  %v80_v47 = vpack.c.bf16 %v904_v14, %v904_v14  ;;  %v117_v53 = vshrl.u32 %v116_v52, 7  ;;  %vm826_vm0 = vmmov 0  }
  0x3e   :  { %290 = vmatprep.subr.bf16.mxu0 %v666_v4  ;;  %621 = vmatpush3.bf16.msra.mxu1 %v709_v18  ;;  %v712_v22 = vld [vmem:[#allocation8 + $0x50] sm:$0xff]   ;;  %v684_v24 = vld [vmem:[#allocation6 + $0x84] ss:$8 sps:$4 sm:$0xff]   ;;  %v714_v26 = vld [vmem:[#allocation8 + $0x58] sm:$0xff]   ;;  %s827_s22 = smov [#allocation9]   ;;  %vm552_vm1 = vcmask 8192  }
  0x3f   :  { %v81_v19 = vpack.c.bf16 %v77_v16, %v77_v16  ;;  %622 = vmatprep.subr.bf16.mxu1 %v710_v20  ;;  %v683_v23 = vld [vmem:[#allocation6 + $0x70] ss:$8 sps:$4 sm:$0xff]   ;;  %v686_v27 = vld [vmem:[#allocation6 + $0x80] ss:$8 sps:$4 sm:$0xff]   ;;  %v687_v28 = vld [vmem:[#allocation6 + $0x94] ss:$8 sps:$4 sm:$0xff]   ;;  %v550_v16 = vstv %s940_s6 }
  0x40   :  { %v713_v25 = vld [vmem:[#allocation8 + $0x10] sm:$0xff]   ;;  %v715_v30 = vld [vmem:[#allocation8 + $0x18] sm:$0xff]   ;;  %v690_v31 = vld [vmem:[#allocation6 + $0xa4] ss:$8 sps:$4 sm:$0xff]   ;;  %v118_v54 = vsub.s32 0, %v117_v53  ;;  %v122_v56 = vsub.s32 1, %v117_v53 }
  0x41   :  { %291 = vmatpush1.bf16.msra.mxu0 %v668_v5  ;;  %318 = vmatprep.mubr.bf16.mxu0 %v81_v19  ;;  %v689_v29 = vld [vmem:[#allocation6 + $0x90] ss:$8 sps:$4 sm:$0xff]   ;;  %v716_v32 = vld [vmem:[#allocation8 + $0x60] sm:$0xff]   ;;  %v718_v34 = vld [vmem:[#allocation8 + $0x68] sm:$0xff]   ;;  %v825_v5 = vmov 0.0   ;;  %s560_s23 = sshll.u32 %s827_s22, 4  ;;  %s561_s23 = int_to_ptr.vmem [resolvable:$true] %s560_s23 }
  0x42   :  { %292 = vmatprep.subr.bf16.mxu0 %v669_v6  ;;  %623 = vmatpush3.bf16.msra.mxu1 %v711_v21  ;;  %v717_v33 = vld [vmem:[#allocation8 + $0x20] sm:$0xff]   ;;  %v693_v36 = vld [vmem:[#allocation6 + $0xb4] ss:$8 sps:$4 sm:$0xff]   ;;  %v719_v37 = vld [vmem:[#allocation8 + $0x28] sm:$0xff]   ;;  %s794_s24 = scalar_lea.vmem %s561_s23, 32  ;;  %p795_p11 = scmp.lt.s32.totalorder %s561_s23, %s561_s23 }
  0x43   :  { %624 = vmatprep.subr.bf16.mxu1 %v712_v22  ;;  %v692_v35 = vld [vmem:[#allocation6 + $0xa0] ss:$8 sps:$4 sm:$0xff]   ;;  %v695_v38 = vld [vmem:[#allocation6 + $0xb0] ss:$8 sps:$4 sm:$0xff]   ;;  %v696_v39 = vld [vmem:[#allocation6 + $0xc4] ss:$8 sps:$4 sm:$0xff]  }
  0x44   :  { %v698_v40 = vld [vmem:[#allocation6 + $0xc0] ss:$8 sps:$4 sm:$0xff]   ;;  %v699_v41 = vld [vmem:[#allocation6 + $0xd4] ss:$8 sps:$4 sm:$0xff]   ;;  %v701_v42 = vld [vmem:[#allocation6 + $0xd0] ss:$8 sps:$4 sm:$0xff]  }
  0x45   :  { %293 = vmatpush1.bf16.msra.mxu0 %v671_v7  ;;  %v702_v43 = vld [vmem:[#allocation6 + $0xe4] ss:$8 sps:$4 sm:$0xff]   ;;  %v704_v44 = vld [vmem:[#allocation6 + $0xe0] ss:$8 sps:$4 sm:$0xff]   ;;  %v705_v45 = vld [vmem:[#allocation6 + $0xf4] ss:$8 sps:$4 sm:$0xff]  }
  0x46   :  { %294 = vmatprep.subr.bf16.mxu0 %v672_v8  ;;  %625 = vmatpush3.bf16.msra.mxu1 %v713_v25  ;;  %v707_v46 = vld [vmem:[#allocation6 + $0xf0] ss:$8 sps:$4 sm:$0xff]   ;;  %v114_v55 = vld [vmem:[%s936_s2] sm:$0x3] }
  0x47   :  { %626 = vmatprep.subr.bf16.mxu1 %v714_v26  ;;  %v720_v48 = vld [vmem:[#allocation8 + $0x70] sm:$0xff]   ;;  %v722_v50 = vld [vmem:[#allocation8 + $0x78] sm:$0xff]   ;;  %v119_v57 = vrot.slane %v114_v55, %v118_v54  ;;  %v123_v58 = vrot.slane %v114_v55, %v122_v56 }
  0x48   :  { %v721_v49 = vld [vmem:[#allocation8 + $0x30] sm:$0xff]   ;;  %v723_v51 = vld [vmem:[#allocation8 + $0x38] sm:$0xff]  }
  0x49   :  { %295 = vmatpush1.bf16.msra.mxu0 %v674_v9  ;;  %v603_v7 = vld [vmem:[%s938_s4] ss:$0 sm:$0xff]  ;;  %s790_s4 = scalar_lea.vmem %s561_s23, 16 }
  0x4a   :  { %296 = vmatprep.subr.bf16.mxu0 %v675_v10  ;;  %627 = vmatpush3.bf16.msra.mxu1 %v715_v30  ;;  %p791_p10 = scmp.ne.s32.totalorder %s561_s23, %s790_s4  ;;  %p796_p12 = scmp.lt.s32.totalorder %s794_s24, %s790_s4 }
  0x4b   :  { %628 = vmatprep.subr.bf16.mxu1 %v716_v32 }
  0x4c   :  { %p797_p13 = por %p796_p12, %p795_p11 }
  0x4d   :  { %297 = vmatpush1.bf16.msra.mxu0 %v677_v11 }
  0x4e   :  { %298 = vmatprep.subr.bf16.mxu0 %v678_v12  ;;  %629 = vmatpush3.bf16.msra.mxu1 %v717_v33  ;;  %p798_p0 = pnand %p797_p13, %p791_p10 }
  0x4f   :  { %630 = vmatprep.subr.bf16.mxu1 %v718_v34 }
  0x51   :  { %299 = vmatpush1.bf16.msra.mxu0 %v680_v13 }
  0x52   :  { %300 = vmatprep.subr.bf16.mxu0 %v681_v15  ;;  %631 = vmatpush3.bf16.msra.mxu1 %v719_v37  ;;  %v507_v15 = vld [vmem:[%s939_s5] sm:$0xf] }
  0x53   :  { %632 = vmatprep.subr.bf16.mxu1 %v720_v48 }
  0x55   :  { %301 = vmatpush1.bf16.msra.mxu0 %v683_v23 }
  0x56   :  { %302 = vmatprep.subr.bf16.mxu0 %v684_v24  ;;  %633 = vmatpush3.bf16.msra.mxu1 %v721_v49 }
  0x57   :  { %634 = vmatprep.subr.bf16.mxu1 %v722_v50 }
  0x59   :  { %303 = vmatpush1.bf16.msra.mxu0 %v686_v27 }
  0x5a   :  { %304 = vmatprep.subr.bf16.mxu0 %v687_v28  ;;  %635 = vmatpush3.bf16.msra.mxu1 %v723_v51 }
  0x5b   :  { %644 = vmatprep.subr.bf16.mxu1 %v825_v5 }
  0x5d   :  { %305 = vmatpush1.bf16.msra.mxu0 %v689_v29 }
  0x5e   :  { %306 = vmatprep.subr.bf16.mxu0 %v690_v31 }
  0x61   :  { %307 = vmatpush1.bf16.msra.mxu0 %v692_v35 }
  0x62   :  { %308 = vmatprep.subr.bf16.mxu0 %v693_v36 }
  0x65   :  { %309 = vmatpush1.bf16.msra.mxu0 %v695_v38 }
  0x66   :  { %310 = vmatprep.subr.bf16.mxu0 %v696_v39 }
  0x69   :  { %311 = vmatpush1.bf16.msra.mxu0 %v698_v40 }
  0x6a   :  { %312 = vmatprep.subr.bf16.mxu0 %v699_v41 }
  0x6d   :  { %313 = vmatpush1.bf16.msra.mxu0 %v701_v42 }
  0x6e   :  { %314 = vmatprep.subr.bf16.mxu0 %v702_v43 }
  0x71   :  { %315 = vmatpush1.bf16.msra.mxu0 %v704_v44 }
  0x72   :  { %316 = vmatprep.subr.bf16.mxu0 %v705_v45 }
  0x75   :  { %317 = vmatpush1.bf16.msra.mxu0 %v707_v46 }
  0x78   :  { %319 = vmatmul.mubr.bf16.vlgmr.msra.gmra.mrb[0].mxu0 %v80_v47 }
 0x14b   :  { %v320_v59 = vpop.f32.mrb[0].mxu0 }
 0x14c   :  { %v321_v60 = vadd.f32 %v320_v59, %v119_v57  ;;  %v322_v61 = vpop.f32.mrb[1].mxu0 }
 0x14d   :  { %v323_v62 = vadd.f32 %v322_v61, %v123_v58  ;;  %v324_v63 = vpop.f32.mrb[2].mxu0 }
 0x14e   :  { %v327_v0 = vmax.f32 %v321_v60, 0.0  ;;  %v325_v1 = vpop.f32.mrb[3].mxu0 }
 0x14f   :  { %v328_v2 = vmax.f32 %v323_v62, 0.0 }
 0x150   :  { %v329_v4 = vpack.c.bf16 %v327_v0, %v327_v0 }
 0x151   :  { %v330_v3 = vpack.c.bf16 %v328_v2, %v328_v2 }
 0x153   :  { %498 = vmatprep.mubr.bf16.mxu1 %v330_v3 }
 0x154   :  { %499 = vmatmul.mubr.bf16.vlgmr.msra.gmra.mrb[0].mxu1 %v329_v4 }
 0x155   :  { %646 = vmatprep.mubr.msk.bf16.mxu1 %vm826_vm0, %v825_v5 }
 0x227   :  { %v636_v6 = vpop.f32.mrb[0].mxu1 }
 0x228   :  { %v637_v8 = vpop.f32.mrb[1].mxu1 }
 0x229   :  { %v638_v9 = vadd.f32 %v637_v8, %v636_v6  ;;  %v639_v10 = vpop.f32.mrb[2].mxu1 }
 0x22a   :  { %v640_v11 = vpop.f32.mrb[3].mxu1 }
 0x22b   :  { %v501_v12 = vadd.f32 %v638_v9, %v603_v7 }
 0x22d   :  { %v506_v13 = vmax.f32 %v501_v12, 0.0 }
 0x22f   :  { %v508_v14 = vpack.c.bf16 %v506_v13, %v506_v13 }
 0x231   :  { %645 = vmatpush3.bf16.xpose.msra.mxu1 %v508_v14 }
 0x238   :  { %647 = vmatmul.mubr.bf16.vlgmr.msra.gmra.mrb[4].mxu1 %v507_v15 }
 0x30b   :  { %v543_v17 = vpop.f32.mrb[4].mxu1 }
 0x30c   :  { %v551_v18 = vadd.f32 %v550_v16, %v543_v17  ;;  %v648_v19 = vpop.f32.mrb[5].mxu1 }
 0x30d   :  { %v546_v20 = vpop.f32.mrb[6].mxu1 }
 0x30e   :  { %v649_v21 = vpop.f32.mrb[7].mxu1  ;;  %553 = vst.msk [vmem:[#allocation9] sm:$0x1] %vm552_vm1, %v551_v18 }
 0x30f   :  { %801 = shalt.err (!%p798_p0)
}
 0x310   :  { %s802_s26 = scalar_lea.hbm %s941_s7, 16 }
 0x311   :  { %p803_p1 = scmp.ne.s32.totalorder %s941_s7, %s802_s26  ;;  %p806_p2 = scmp.lt.u32.totalorder %s802_s26, %s941_s7 }
 0x313   :  { %p808_p3 = pnand %p806_p2, %p803_p1 }
 0x315   :  { %811 = shalt.err (!%p808_p3)
}
 0x316   :  { %563 = dma.vmem_to_hbm [thread:$0]  %s561_s23, 16, %s941_s7, [#allocation5]  }
 0x317   :  { %816 = dma.done.wait [#allocation5], 16  }
 0x318   :  { %817 = vsyncadd [#allocation5], 4294967280 }
 0x319   :  { %567 = vsyncpa [#allocation4], 1 }
 0x31a   :  { %568 = vsyncpa [#allocation7], 1 }
 0x31b   :  { %569 = vsyncpa [#allocation5], 1 }

</bundles_post_ra>
